<compile_context>
chip_gen: v7x
topology: tpu7x:2x2x1
jax: 0.10.0
libtpu: 0.0.40
codegen_flags: <defaults>
</compile_context>

<pallas_src>
import numpy as np
import jax
import jax.numpy as jnp
from jax.experimental import pallas as pl
from jax.experimental.pallas import tpu as pltpu

# ----------------------------------------------------------------------------
# Problem sizes (D_in >= 3 coordinates, D_out = 4 monopole amplitudes).
# ----------------------------------------------------------------------------
B = 8            # batch
D_IN = 8         # input features (first 3 are xyz coordinates)
H = 32           # hidden_layer_size
D_OUT = 4        # monopole amplitudes
NUM_LAYERS = 2   # c.Num_layers

# ----------------------------------------------------------------------------
# Physical constants (stand-ins for the config object `c`).
# ----------------------------------------------------------------------------
MONO_LOC = np.array([[0.0, 1.0, 0.0, -1.0],
                     [1.0, 0.0, -1.0, 0.0],
                     [0.5, 0.5, 0.5, 0.5]], dtype=np.float32)   # (3, 4)
KAPPA   = np.array([1.0, 1.1, 1.2, 1.3], dtype=np.float32)      # (4,)
PHI     = np.array([[0.0, 0.1, 0.2, 0.3]], dtype=np.float32)    # (1, 4)
T0      = 1.0
P_REF   = 2.0e-5
LB_NORM = 0.0
UB_NORM = 120.0
BN_EPS  = 1e-5

# Compile-time folded scalars.
TEN_OVER_LN10 = float(10.0 / np.log(10.0))
SPL_OFFSET    = float(20.0 * np.log10(T0 / P_REF))   # 20*log10(T0/P_ref)
INV_RANGE     = float(1.0 / (UB_NORM - LB_NORM))
MAG2_EPS      = 1e-30   # guards log(0) if a point coincides with a monopole


def fc_kernel(x_ref, mono_ref, w_in_ref, b_in_ref, w_h_ref, b_h_ref,
              w_out_ref, b_out_ref, o_ref):
    xt = x_ref[...]                                   # (D_IN, TB), batch on lanes

    # linear_in (BatchNorm folded into w_in/b_in host-side)
    h = jnp.dot(w_in_ref[...], xt, preferred_element_type=jnp.float32) + b_in_ref[...]

    # hidden stack: Linear -> (dropout = identity in eval) -> ReLU
    for i in range(NUM_LAYERS):
        h = jnp.dot(w_h_ref[i], h, preferred_element_type=jnp.float32) + b_h_ref[i]
        h = jnp.maximum(h, 0.0)

    # linear_out -> monopole amplitudes, (4, TB)
    amp = jnp.dot(w_out_ref[...], h, preferred_element_type=jnp.float32) + b_out_ref[...]

    # Vectorized 4-monopole superposition: one rsqrt/cos/sin on (4, TB).
    mono = mono_ref[...]                              # (4, 5): [x, y, z, kappa, phi]
    dx = xt[0:1, :] - mono[:, 0:1]
    dy = xt[1:2, :] - mono[:, 1:2]
    dz = xt[2:3, :] - mono[:, 2:3]
    d2 = dx * dx + dy * dy + dz * dz                  # (4, TB)
    inv_r = jax.lax.rsqrt(d2)
    r = d2 * inv_r                                    # == sqrt(d2), no divide
    theta = mono[:, 4:5] - mono[:, 3:4] * r           # phi_n - kappa_n * r
    a = amp * inv_r                                   # out[:, n] / r
    p_re = jnp.sum(a * jnp.cos(theta), axis=0, keepdims=True)   # (1, TB)
    p_im = jnp.sum(a * jnp.sin(theta), axis=0, keepdims=True)   # (1, TB)

    # 20*log10(|T0*p/P_ref|) == 10*log10(|p|^2) + 20*log10(T0/P_ref)
    mag2 = jnp.maximum(p_re * p_re + p_im * p_im, MAG2_EPS)
    spl = TEN_OVER_LN10 * jnp.log(mag2) + SPL_OFFSET
    o_ref[...] = (spl - LB_NORM) * INV_RANGE          # (1, TB) lane-dense store


def prepare_kernel_params(params):
    """Fold eval-mode BatchNorm1d into linear_in; reshape biases to columns."""
    gamma, beta, mean, var, w_in, b_in, w_h, b_h, w_out, b_out = params
    s = gamma * jax.lax.rsqrt(var + BN_EPS)           # (D_IN,)
    shift = beta - mean * s                           # (D_IN,)
    w_in_f = w_in * s[None, :]                        # (H, D_IN)
    b_in_f = (b_in + w_in @ shift)[:, None]           # (H, 1)
    mono = jnp.asarray(np.concatenate(
        [MONO_LOC.T, KAPPA[:, None], PHI.T], axis=1), jnp.float32)   # (4, 5)
    return (mono, w_in_f, b_in_f, w_h, b_h[:, :, None], w_out, b_out[:, None])


def fully_connected_forward(x, params, tb=128):
    """x: (B, D_in) float32 -> (B, 1) normalized SPL (same as the module)."""
    assert tb % 128 == 0
    bsz, d_in = x.shape
    b_pad = ((bsz + tb - 1) // tb) * tb
    # Batch on the lane axis (lane-dense compute + store); pad to the tile size.
    xt = jnp.pad(x.astype(jnp.float32).T, ((0, 0), (0, b_pad - bsz)),
                 constant_values=1.0)                 # (D_in, b_pad)

    mono, w_in, b_in, w_h, b_h, w_out, b_out = prepare_kernel_params(params)
    num_layers, hidden = w_h.shape[0], w_h.shape[1]
    d_out = w_out.shape[0]
    grid = (b_pad // tb,)

    out = pl.pallas_call(
        fc_kernel,
        out_shape=jax.ShapeDtypeStruct((1, b_pad), jnp.float32),
        grid=grid,
        in_specs=[
            pl.BlockSpec((d_in, tb), lambda i: (0, i)),                       # x tile
            pl.BlockSpec((4, 5), lambda i: (0, 0)),                           # monopole consts
            pl.BlockSpec((hidden, d_in), lambda i: (0, 0)),                   # w_in (BN folded)
            pl.BlockSpec((hidden, 1), lambda i: (0, 0)),                      # b_in
            pl.BlockSpec((num_layers, hidden, hidden), lambda i: (0, 0, 0)),  # w_h
            pl.BlockSpec((num_layers, hidden, 1), lambda i: (0, 0, 0)),       # b_h
            pl.BlockSpec((d_out, hidden), lambda i: (0, 0)),                  # w_out
            pl.BlockSpec((d_out, 1), lambda i: (0, 0)),                       # b_out
        ],
        out_specs=pl.BlockSpec((1, tb), lambda i: (0, i)),
        compiler_params=pltpu.CompilerParams(
            dimension_semantics=("parallel",)),   # batch tiles shard across TCs on v7x
    )(xt, mono, w_in, b_in, w_h, b_h, w_out, b_out)

    return out[0, :bsz].reshape(bsz, 1)


def init_params(key):
    """Module-style params in PyTorch layout (weights are (fan_out, fan_in))."""
    ks = jax.random.split(key, NUM_LAYERS + 2)

    def linear(k, fan_in, fan_out):
        kw, kb = jax.random.split(k)
        bound = 1.0 / np.sqrt(fan_in)
        w = jax.random.uniform(kw, (fan_out, fan_in), jnp.float32, -bound, bound)
        b = jax.random.uniform(kb, (fan_out,), jnp.float32, -bound, bound)
        return w, b

    gamma = jnp.ones((D_IN,), jnp.float32)
    beta = jnp.zeros((D_IN,), jnp.float32)
    mean = jnp.zeros((D_IN,), jnp.float32)
    var = jnp.ones((D_IN,), jnp.float32)

    w_in, b_in = linear(ks[0], D_IN, H)
    w_h_list, b_h_list = [], []
    for i in range(NUM_LAYERS):
        w, bb = linear(ks[1 + i], H, H)
        w_h_list.append(w)
        b_h_list.append(bb)
    w_h = jnp.stack(w_h_list)                  # (L, H, H)
    b_h = jnp.stack(b_h_list)                  # (L, H)
    w_out, b_out = linear(ks[1 + NUM_LAYERS], H, D_OUT)
    return (gamma, beta, mean, var, w_in, b_in, w_h, b_h, w_out, b_out)


def reference_forward(x, params):
    """Pure-JAX reference mirroring the PyTorch module (eval mode)."""
    gamma, beta, mean, var, w_in, b_in, w_h, b_h, w_out, b_out = params
    xn = (x - mean) * jax.lax.rsqrt(var + BN_EPS) * gamma + beta
    h = xn @ w_in.T + b_in
    for i in range(NUM_LAYERS):
        h = jnp.maximum(h @ w_h[i].T + b_h[i], 0.0)
    out = h @ w_out.T + b_out                  # (B, 4)
    p_re = jnp.zeros((x.shape[0],), jnp.float32)
    p_im = jnp.zeros((x.shape[0],), jnp.float32)
    for n in range(4):
        r = jnp.sqrt((x[:, 0] - MONO_LOC[0, n]) ** 2
                     + (x[:, 1] - MONO_LOC[1, n]) ** 2
                     + (x[:, 2] - MONO_LOC[2, n]) ** 2)
        theta = -KAPPA[n] * r + PHI[0, n]
        p_re = p_re + out[:, n] * jnp.cos(theta) / r
        p_im = p_im + out[:, n] * jnp.sin(theta) / r
    tr = T0 * p_re / P_REF
    ti = T0 * p_im / P_REF
    re = jnp.sqrt(tr * tr + ti * ti)
    spl = 20.0 * jnp.log(jnp.abs(re)) / jnp.log(10.0)
    spl = (spl - LB_NORM) * (1.0 - 0.0) / (UB_NORM - LB_NORM) + 0.0
    return spl.reshape(-1, 1)


if __name__ == "__main__":
    key = jax.random.PRNGKey(0)
    kx, kp = jax.random.split(key)
    # Offset coordinates so r (distance to monopoles) stays away from zero.
    x = jax.random.normal(kx, (B, D_IN), jnp.float32) + 3.0
    params = init_params(kp)

    y = fully_connected_forward(x, params)
    y = jax.block_until_ready(y)
    y_ref = reference_forward(x, params)

    assert y.shape == (B, 1)
    assert bool(jnp.all(jnp.isfinite(y)))
    assert bool(jnp.allclose(y, y_ref, rtol=5e-3, atol=5e-3))
    print("KERNEL_OK")
</pallas_src>

<mosaic_0001>
module attributes {stable_mosaic.version = 11 : i64} {
  func.func @fc_kernel(%arg0: i32, %arg1: memref<8x128xf32, #tpu.memory_space<vmem>>, %arg2: memref<4x5xf32, #tpu.memory_space<vmem>>, %arg3: memref<32x8xf32, #tpu.memory_space<vmem>>, %arg4: memref<32x1xf32, #tpu.memory_space<vmem>>, %arg5: memref<2x32x32xf32, #tpu.memory_space<vmem>>, %arg6: memref<2x32x1xf32, #tpu.memory_space<vmem>>, %arg7: memref<4x32xf32, #tpu.memory_space<vmem>>, %arg8: memref<4x1xf32, #tpu.memory_space<vmem>>, %arg9: memref<1x128xf32, #tpu.memory_space<vmem>>) attributes {dimension_semantics = [#tpu.dimension_semantics<parallel>], iteration_bounds = array<i64: 1>, scalar_prefetch = 0 : i64, scratch_operands = 0 : i64, tpu.core_type = #tpu.core_type<tc>, window_params = [{transform_indices = @transform_0, window_bounds = array<i64: 8, 128>}, {pipeline_mode = #tpu.pipeline_mode<synchronous>, transform_indices = @transform_1, window_bounds = array<i64: 4, 5>}, {pipeline_mode = #tpu.pipeline_mode<synchronous>, transform_indices = @transform_2, window_bounds = array<i64: 32, 8>}, {pipeline_mode = #tpu.pipeline_mode<synchronous>, transform_indices = @transform_3, window_bounds = array<i64: 32, 1>}, {pipeline_mode = #tpu.pipeline_mode<synchronous>, transform_indices = @transform_4, window_bounds = array<i64: 2, 32, 32>}, {pipeline_mode = #tpu.pipeline_mode<synchronous>, transform_indices = @transform_5, window_bounds = array<i64: 2, 32, 1>}, {pipeline_mode = #tpu.pipeline_mode<synchronous>, transform_indices = @transform_6, window_bounds = array<i64: 4, 32>}, {pipeline_mode = #tpu.pipeline_mode<synchronous>, transform_indices = @transform_7, window_bounds = array<i64: 4, 1>}, {transform_indices = @transform_8, window_bounds = array<i64: 1, 128>}]} {
    %c0 = arith.constant 0 : index
    %c0_0 = arith.constant 0 : index
    %0 = vector.load %arg1[%c0, %c0_0] : memref<8x128xf32, #tpu.memory_space<vmem>>, vector<8x128xf32>
    %c0_1 = arith.constant 0 : index
    %c0_2 = arith.constant 0 : index
    %1 = vector.load %arg3[%c0_1, %c0_2] : memref<32x8xf32, #tpu.memory_space<vmem>>, vector<32x8xf32>
    %cst = arith.constant dense<0.000000e+00> : vector<32x128xf32>
    %2 = tpu.matmul %1, %0, %cst {dimension_numbers = #tpu.dot_dimension_numbers<[1], [0], [0], [1], [0, 0, 1, 1], [], []>} : vector<32x8xf32>, vector<8x128xf32>, vector<32x128xf32> -> vector<32x128xf32>
    %c0_3 = arith.constant 0 : index
    %c0_4 = arith.constant 0 : index
    %3 = vector.load %arg4[%c0_3, %c0_4] : memref<32x1xf32, #tpu.memory_space<vmem>>, vector<32x1xf32>
    %4 = vector.broadcast %3 : vector<32x1xf32> to vector<32x128xf32>
    %5 = arith.addf %2, %4 : vector<32x128xf32>
    %c0_5 = arith.constant 0 : index
    %c0_6 = arith.constant 0 : index
    %c0_7 = arith.constant 0 : index
    %6 = vector.load %arg5[%c0_5, %c0_6, %c0_7] : memref<2x32x32xf32, #tpu.memory_space<vmem>>, vector<1x32x32xf32>
    %7 = vector.shape_cast %6 : vector<1x32x32xf32> to vector<32x32xf32>
    %cst_8 = arith.constant dense<0.000000e+00> : vector<32x128xf32>
    %8 = tpu.matmul %7, %5, %cst_8 {dimension_numbers = #tpu.dot_dimension_numbers<[1], [0], [0], [1], [0, 0, 1, 1], [], []>} : vector<32x32xf32>, vector<32x128xf32>, vector<32x128xf32> -> vector<32x128xf32>
    %c0_9 = arith.constant 0 : index
    %c0_10 = arith.constant 0 : index
    %c0_11 = arith.constant 0 : index
    %9 = vector.load %arg6[%c0_9, %c0_10, %c0_11] : memref<2x32x1xf32, #tpu.memory_space<vmem>>, vector<1x32x1xf32>
    %10 = vector.shape_cast %9 : vector<1x32x1xf32> to vector<32x1xf32>
    %11 = vector.broadcast %10 : vector<32x1xf32> to vector<32x128xf32>
    %12 = arith.addf %8, %11 : vector<32x128xf32>
    %cst_12 = arith.constant 0.000000e+00 : f32
    %13 = vector.broadcast %cst_12 : f32 to vector<32x128xf32>
    %14 = arith.maximumf %12, %13 : vector<32x128xf32>
    %c1 = arith.constant 1 : index
    %c0_13 = arith.constant 0 : index
    %c0_14 = arith.constant 0 : index
    %15 = vector.load %arg5[%c1, %c0_13, %c0_14] : memref<2x32x32xf32, #tpu.memory_space<vmem>>, vector<1x32x32xf32>
    %16 = vector.shape_cast %15 : vector<1x32x32xf32> to vector<32x32xf32>
    %cst_15 = arith.constant dense<0.000000e+00> : vector<32x128xf32>
    %17 = tpu.matmul %16, %14, %cst_15 {dimension_numbers = #tpu.dot_dimension_numbers<[1], [0], [0], [1], [0, 0, 1, 1], [], []>} : vector<32x32xf32>, vector<32x128xf32>, vector<32x128xf32> -> vector<32x128xf32>
    %c1_16 = arith.constant 1 : index
    %c0_17 = arith.constant 0 : index
    %c0_18 = arith.constant 0 : index
    %18 = vector.load %arg6[%c1_16, %c0_17, %c0_18] : memref<2x32x1xf32, #tpu.memory_space<vmem>>, vector<1x32x1xf32>
    %19 = vector.shape_cast %18 : vector<1x32x1xf32> to vector<32x1xf32>
    %20 = vector.broadcast %19 : vector<32x1xf32> to vector<32x128xf32>
    %21 = arith.addf %17, %20 : vector<32x128xf32>
    %cst_19 = arith.constant 0.000000e+00 : f32
    %22 = vector.broadcast %cst_19 : f32 to vector<32x128xf32>
    %23 = arith.maximumf %21, %22 : vector<32x128xf32>
    %c0_20 = arith.constant 0 : index
    %c0_21 = arith.constant 0 : index
    %24 = vector.load %arg7[%c0_20, %c0_21] : memref<4x32xf32, #tpu.memory_space<vmem>>, vector<4x32xf32>
    %cst_22 = arith.constant dense<0.000000e+00> : vector<4x128xf32>
    %25 = tpu.matmul %24, %23, %cst_22 {dimension_numbers = #tpu.dot_dimension_numbers<[1], [0], [0], [1], [0, 0, 1, 1], [], []>} : vector<4x32xf32>, vector<32x128xf32>, vector<4x128xf32> -> vector<4x128xf32>
    %c0_23 = arith.constant 0 : index
    %c0_24 = arith.constant 0 : index
    %26 = vector.load %arg8[%c0_23, %c0_24] : memref<4x1xf32, #tpu.memory_space<vmem>>, vector<4x1xf32>
    %27 = vector.broadcast %26 : vector<4x1xf32> to vector<4x128xf32>
    %28 = arith.addf %25, %27 : vector<4x128xf32>
    %c0_25 = arith.constant 0 : index
    %c0_26 = arith.constant 0 : index
    %29 = vector.load %arg2[%c0_25, %c0_26] : memref<4x5xf32, #tpu.memory_space<vmem>>, vector<4x5xf32>
    %30 = vector.extract_strided_slice %0 {offsets = [0, 0], sizes = [1, 128], strides = [1, 1]} : vector<8x128xf32> to vector<1x128xf32>
    %31 = vector.extract_strided_slice %29 {offsets = [0, 0], sizes = [4, 1], strides = [1, 1]} : vector<4x5xf32> to vector<4x1xf32>
    %32 = vector.broadcast %30 : vector<1x128xf32> to vector<4x128xf32>
    %33 = vector.broadcast %31 : vector<4x1xf32> to vector<4x128xf32>
    %34 = arith.subf %32, %33 : vector<4x128xf32>
    %35 = vector.extract_strided_slice %0 {offsets = [1, 0], sizes = [1, 128], strides = [1, 1]} : vector<8x128xf32> to vector<1x128xf32>
    %36 = vector.extract_strided_slice %29 {offsets = [0, 1], sizes = [4, 1], strides = [1, 1]} : vector<4x5xf32> to vector<4x1xf32>
    %37 = vector.broadcast %35 : vector<1x128xf32> to vector<4x128xf32>
    %38 = vector.broadcast %36 : vector<4x1xf32> to vector<4x128xf32>
    %39 = arith.subf %37, %38 : vector<4x128xf32>
    %40 = vector.extract_strided_slice %0 {offsets = [2, 0], sizes = [1, 128], strides = [1, 1]} : vector<8x128xf32> to vector<1x128xf32>
    %41 = vector.extract_strided_slice %29 {offsets = [0, 2], sizes = [4, 1], strides = [1, 1]} : vector<4x5xf32> to vector<4x1xf32>
    %42 = vector.broadcast %40 : vector<1x128xf32> to vector<4x128xf32>
    %43 = vector.broadcast %41 : vector<4x1xf32> to vector<4x128xf32>
    %44 = arith.subf %42, %43 : vector<4x128xf32>
    %45 = arith.mulf %34, %34 : vector<4x128xf32>
    %46 = arith.mulf %39, %39 : vector<4x128xf32>
    %47 = arith.addf %45, %46 : vector<4x128xf32>
    %48 = arith.mulf %44, %44 : vector<4x128xf32>
    %49 = arith.addf %47, %48 : vector<4x128xf32>
    %50 = math.rsqrt %49 : vector<4x128xf32>
    %51 = arith.mulf %49, %50 : vector<4x128xf32>
    %52 = vector.extract_strided_slice %29 {offsets = [0, 4], sizes = [4, 1], strides = [1, 1]} : vector<4x5xf32> to vector<4x1xf32>
    %53 = vector.extract_strided_slice %29 {offsets = [0, 3], sizes = [4, 1], strides = [1, 1]} : vector<4x5xf32> to vector<4x1xf32>
    %54 = vector.broadcast %53 : vector<4x1xf32> to vector<4x128xf32>
    %55 = arith.mulf %54, %51 : vector<4x128xf32>
    %56 = vector.broadcast %52 : vector<4x1xf32> to vector<4x128xf32>
    %57 = arith.subf %56, %55 : vector<4x128xf32>
    %58 = arith.mulf %28, %50 : vector<4x128xf32>
    %59 = math.cos %57 : vector<4x128xf32>
    %60 = arith.mulf %58, %59 : vector<4x128xf32>
    %cst_27 = arith.constant dense<0.000000e+00> : vector<128xf32>
    %61 = vector.multi_reduction <add>, %60, %cst_27 [0] : vector<4x128xf32> to vector<128xf32>
    %62 = vector.shape_cast %61 : vector<128xf32> to vector<1x128xf32>
    %63 = math.sin %57 : vector<4x128xf32>
    %64 = arith.mulf %58, %63 : vector<4x128xf32>
    %cst_28 = arith.constant dense<0.000000e+00> : vector<128xf32>
    %65 = vector.multi_reduction <add>, %64, %cst_28 [0] : vector<4x128xf32> to vector<128xf32>
    %66 = vector.shape_cast %65 : vector<128xf32> to vector<1x128xf32>
    %67 = arith.mulf %62, %62 : vector<1x128xf32>
    %68 = arith.mulf %66, %66 : vector<1x128xf32>
    %69 = arith.addf %67, %68 : vector<1x128xf32>
    %cst_29 = arith.constant 1.000000e-30 : f32
    %70 = vector.broadcast %cst_29 : f32 to vector<1x128xf32>
    %71 = arith.maximumf %69, %70 : vector<1x128xf32>
    %72 = math.log %71 : vector<1x128xf32>
    %cst_30 = arith.constant 4.34294462 : f32
    %73 = vector.broadcast %cst_30 : f32 to vector<1x128xf32>
    %74 = arith.mulf %73, %72 : vector<1x128xf32>
    %cst_31 = arith.constant 9.397940e+01 : f32
    %75 = vector.broadcast %cst_31 : f32 to vector<1x128xf32>
    %76 = arith.addf %74, %75 : vector<1x128xf32>
    %cst_32 = arith.constant 0.000000e+00 : f32
    %77 = vector.broadcast %cst_32 : f32 to vector<1x128xf32>
    %78 = arith.subf %76, %77 : vector<1x128xf32>
    %cst_33 = arith.constant 0.00833333377 : f32
    %79 = vector.broadcast %cst_33 : f32 to vector<1x128xf32>
    %80 = arith.mulf %78, %79 : vector<1x128xf32>
    %c0_34 = arith.constant 0 : index
    %c0_35 = arith.constant 0 : index
    %81 = vector.load %arg9[%c0_34, %c0_35] : memref<1x128xf32, #tpu.memory_space<vmem>>, vector<1x128xf32>
    tpu.vector_store %arg9[%c0_34, %c0_35], %80 {strides = array<i32>} : memref<1x128xf32, #tpu.memory_space<vmem>>, vector<1x128xf32>,
    return
  }
  func.func @transform_0(%arg0: i32) -> (i32, i32) {
    %c0_i32 = arith.constant 0 : i32
    %c0_i32_0 = arith.constant 0 : i32
    return %c0_i32, %arg0 : i32, i32
  }
  func.func @transform_1(%arg0: i32) -> (i32, i32) {
    %c0_i32 = arith.constant 0 : i32
    %c0_i32_0 = arith.constant 0 : i32
    %c0_i32_1 = arith.constant 0 : i32
    return %c0_i32, %c0_i32_0 : i32, i32
  }
  func.func @transform_2(%arg0: i32) -> (i32, i32) {
    %c0_i32 = arith.constant 0 : i32
    %c0_i32_0 = arith.constant 0 : i32
    %c0_i32_1 = arith.constant 0 : i32
    return %c0_i32, %c0_i32_0 : i32, i32
  }
  func.func @transform_3(%arg0: i32) -> (i32, i32) {
    %c0_i32 = arith.constant 0 : i32
    %c0_i32_0 = arith.constant 0 : i32
    %c0_i32_1 = arith.constant 0 : i32
    return %c0_i32, %c0_i32_0 : i32, i32
  }
  func.func @transform_4(%arg0: i32) -> (i32, i32, i32) {
    %c0_i32 = arith.constant 0 : i32
    %c0_i32_0 = arith.constant 0 : i32
    %c0_i32_1 = arith.constant 0 : i32
    %c0_i32_2 = arith.constant 0 : i32
    return %c0_i32, %c0_i32_0, %c0_i32_1 : i32, i32, i32
  }
  func.func @transform_5(%arg0: i32) -> (i32, i32, i32) {
    %c0_i32 = arith.constant 0 : i32
    %c0_i32_0 = arith.constant 0 : i32
    %c0_i32_1 = arith.constant 0 : i32
    %c0_i32_2 = arith.constant 0 : i32
    return %c0_i32, %c0_i32_0, %c0_i32_1 : i32, i32, i32
  }
  func.func @transform_6(%arg0: i32) -> (i32, i32) {
    %c0_i32 = arith.constant 0 : i32
    %c0_i32_0 = arith.constant 0 : i32
    %c0_i32_1 = arith.constant 0 : i32
    return %c0_i32, %c0_i32_0 : i32, i32
  }
  func.func @transform_7(%arg0: i32) -> (i32, i32) {
    %c0_i32 = arith.constant 0 : i32
    %c0_i32_0 = arith.constant 0 : i32
    %c0_i32_1 = arith.constant 0 : i32
    return %c0_i32, %c0_i32_0 : i32, i32
  }
  func.func @transform_8(%arg0: i32) -> (i32, i32) {
    %c0_i32 = arith.constant 0 : i32
    %c0_i32_0 = arith.constant 0 : i32
    return %c0_i32, %arg0 : i32, i32
  }
}

</mosaic_0001>

<bundles_post_ra>
// kernel: tpu_custom_call.1
= control target key start
LH: loop header
LB: loop body
LE: loop exit
PB: predicated region body
PF: predicated region fallthrough
CT: control target
= control target key end

     0   :  { %vm59_vm0 = vcmask 64512   ;;  %v976_v3 = vmov 0   ;;  %s1215_s0 = inlined_call_operand.vmem [shape: f32[8,128], index: 0, kind: input, shape index: {}]   ;;  %s1216_s1 = inlined_call_operand.vmem [shape: f32[4,5], index: 1, kind: input, shape index: {}]   ;;  %s1217_s2 = inlined_call_operand.vmem [shape: f32[32,8], index: 2, kind: input, shape index: {}]   ;;  %s1218_s3 = inlined_call_operand.vmem [shape: f32[32,1], index: 3, kind: input, shape index: {}]   ;;  %s1219_s4 = inlined_call_operand.vmem [shape: f32[2,32,32], index: 4, kind: input, shape index: {}]   ;;  %s1220_s5 = inlined_call_operand.vmem [shape: f32[2,32,1], index: 5, kind: input, shape index: {}]   ;;  %s1221_s6 = inlined_call_operand.vmem [shape: f32[4,32], index: 6, kind: input, shape index: {}]   ;;  %s1222_s7 = inlined_call_operand.vmem [shape: f32[4,1], index: 7, kind: input, shape index: {}]   ;;  %s1223_s8 = inlined_call_operand.hbm [shape: f32[1,128], index: 8, kind: output, shape index: {}]  }
   0x1   :  { %v1039_v0 = vld [vmem:[%s1215_s0] sm:$0xff]  ;;  %936 = vset.pattern.permute.xlu0 %v976_v3  ;;  %v32_v4 = vld [vmem:[%s1217_s2 + $0x8] sm:$0xff]  ;;  %v37_v5 = vld [vmem:[%s1218_s3 + $0x10] sm:$0xff]  ;;  %937 = vset.pattern.permute.xlu1 %v976_v3 }
   0x2   :  { %v35_v1 = vld [vmem:[%s1218_s3] sm:$0xff]  ;;  %848 = vmatprep.subr.mxu0 %v1039_v0  ;;  %v33_v6 = vld [vmem:[%s1217_s2 + $0x10] sm:$0xff]  ;;  %v36_v7 = vld [vmem:[%s1218_s3 + $0x8] sm:$0xff]  ;;  %51 = vperm.xlu1 %937, %v37_v5  }
   0x3   :  { %v31_v2 = vld [vmem:[%s1217_s2] sm:$0xff]  ;;  %41 = vperm.xlu0 %936, %v35_v1   ;;  %849 = vmatpush3.msra.mxu0 %v1039_v0  ;;  %v34_v8 = vld [vmem:[%s1217_s2 + $0x18] sm:$0xff] }
   0x4   :  { %850 = vmatprep.mubr.msk.f32.mxu0 %vm59_vm0, %v31_v2  ;;  %v38_v9 = vld [vmem:[%s1218_s3 + $0x18] sm:$0xff] }
   0x5   :  { %851 = vmatmul.mubr.msk.f32.vlgmr.msra.gmra.mrb[0].mxu0 %vm59_vm0, %v32_v4 }
   0x6   :  { %853 = vmatprep.mubr.msk.f32.mxu0 %vm59_vm0, %v33_v6 }
   0x7   :  { %46 = vperm.xlu0 %936, %v36_v7  }
   0x8   :  { %13 = vsyncpa [#allocation3], 0  ;;  %v161_v10 = vld [vmem:[%s1220_s5] sm:$0xff]  ;;  %56 = vperm.xlu1 %937, %v38_v9   ;;  %v162_v11 = vld [vmem:[%s1220_s5 + $0x8] sm:$0xff]  ;;  %v977_v19 = vmov 1   ;;  %v978_v20 = vmov 2   ;;  %v499_v29 = vlaneseq }
   0x9   :  { %854 = vmatmul.mubr.msk.f32.gmra.mrb[2].mxu0 %vm59_vm0, %v34_v8  ;;  %v163_v12 = vld [vmem:[%s1220_s5 + $0x10] sm:$0xff]  ;;  %v164_v13 = vld [vmem:[%s1220_s5 + $0x18] sm:$0xff]  ;;  %v805_v14 = vld [vmem:[%s1220_s5 + $0x20] sm:$0xff]  ;;  %v979_v21 = vmov 3   ;;  %v980_v22 = vmov 4   ;;  %vm185_vm1 = vcmask 261120  }
   0xa   :  { %v806_v15 = vld [vmem:[%s1220_s5 + $0x28] sm:$0xff]  ;;  %v807_v16 = vld [vmem:[%s1220_s5 + $0x30] sm:$0xff]  ;;  %v808_v17 = vld [vmem:[%s1220_s5 + $0x38] sm:$0xff]  ;;  %v500_v32 = vshrl.u32 %v499_v29, 7  ;;  %v981_v8 = vmov 683565275  }
   0xb   :  { %167 = vperm.xlu0 %936, %v161_v10   ;;  %v498_v18 = vld [vmem:[%s1216_s1] sm:$0xf]  ;;  %v982_v10 = vmov 2475754826   ;;  %v986_v29 = vmov 1326507024  }
   0xc   :  { %172 = vperm.xlu1 %937, %v162_v11   ;;  %v157_v23 = vld [vmem:[%s1219_s4] sm:$0xff]  ;;  %v501_v35 = vsub.s32 0, %v500_v32  ;;  %v511_v38 = vsub.s32 1, %v500_v32  ;;  %v520_v41 = vsub.s32 2, %v500_v32 }
   0xd   :  { %864 = vmatprep.mubr.msk.f32.mxu1 %vm185_vm1, %v157_v23 }
   0xe   :  { %v502_v39 = vrot.slane %v1039_v0, %v501_v35  ;;  %v512_v43 = vrot.slane %v1039_v0, %v511_v38  ;;  %v521_v45 = vrot.slane %v1039_v0, %v520_v41 }
   0xf   :  { %177 = vperm.xlu0 %936, %v163_v12   ;;  %v983_v12 = vmov 2131351028  }
  0x10   :  { %182 = vperm.xlu1 %937, %v164_v13  }
  0x13   :  { %299 = vperm.xlu0 %936, %v805_v14   ;;  %v984_v14 = vmov 2102212464  }
  0x14   :  { %304 = vperm.xlu1 %937, %v806_v15  }
  0x17   :  { %309 = vperm.xlu0 %936, %v807_v16   ;;  %v985_v16 = vmov 920167782  }
  0x18   :  { %314 = vperm.xlu1 %937, %v808_v17  }
  0x1b   :  { %505 = vperm.xlu0 %936, %v498_v18  }
  0x1c   :  { %938 = vset.pattern.permute.xlu1 %v977_v19 }
  0x1d   :  { %514 = vperm.xlu1 %938, %v498_v18  }
  0x1f   :  { %939 = vset.pattern.permute.xlu0 %v978_v20 }
  0x20   :  { %523 = vperm.xlu0 %939, %v498_v18  }
  0x21   :  { %940 = vset.pattern.permute.xlu1 %v979_v21 }
  0x22   :  { %535 = vperm.xlu1 %940, %v498_v18  }
  0x24   :  { %942 = vset.pattern.permute.xlu0 %v976_v3 }
  0x26   :  { %941 = vset.pattern.permute.xlu1 %v980_v22 }
  0x27   :  { %540 = vperm.xlu1 %941, %v498_v18  }
  0x81   :  { %v1105_v25 = vpop.permute.xlu1 %51 }
  0x82   :  { %v1103_v24 = vpop.permute.xlu0 %41 }
  0x86   :  { %v1107_v26 = vpop.permute.xlu0 %46 }
  0x87   :  { %v1109_v27 = vpop.permute.xlu1 %56 }
  0x8a   :  { %v1111_v28 = vpop.permute.xlu0 %167 }
  0x8b   :  { %v1113_v30 = vpop.permute.xlu1 %172 }
  0x8e   :  { %v1115_v31 = vpop.permute.xlu0 %177 }
  0x8f   :  { %v1117_v33 = vpop.permute.xlu1 %182 }
  0x92   :  { %v1119_v34 = vpop.permute.xlu0 %299 }
  0x93   :  { %v1121_v36 = vpop.permute.xlu1 %304 }
  0x96   :  { %v1123_v37 = vpop.permute.xlu0 %309 }
  0x97   :  { %v1126_v40 = vpop.permute.xlu1 %314 }
  0x9a   :  { %v506_v42 = vpop.permute.xlu0 %505 }
  0x9b   :  { %v508_v44 = vsub.f32 %v502_v39, %v506_v42 }
  0x9c   :  { %v515_v46 = vpop.permute.xlu1 %514 }
  0x9d   :  { %v527_v47 = vmul.f32 %v508_v44, %v508_v44  ;;  %v517_v48 = vsub.f32 %v512_v43, %v515_v46 }
  0x9f   :  { %v524_v49 = vpop.permute.xlu0 %523  ;;  %v528_v50 = vmul.f32 %v517_v48, %v517_v48 }
  0xa0   :  { %v526_v51 = vsub.f32 %v521_v45, %v524_v49 }
  0xa1   :  { %v529_v52 = vadd.f32 %v528_v50, %v527_v47  ;;  %v536_v55 = vpop.permute.xlu1 %535 }
  0xa2   :  { %v530_v53 = vmul.f32 %v526_v51, %v526_v51 }
  0xa4   :  { %v531_v54 = vadd.f32 %v530_v53, %v529_v52 }
  0xa6   :  { %944 = vrsqrt.f32 %v531_v54  ;;  %v541_v58 = vpop.permute.xlu1 %540 }
  0xb0   :  { %v1130_v56 = vpop.eup %944 }
  0xb1   :  { %v533_v57 = vmul.f32 %v1130_v56, %v531_v54 }
  0xb3   :  { %v538_v59 = vmul.f32 %v536_v55, %v533_v57 }
  0xb5   :  { %v1133_v60 = vsub.f32 %v541_v58, %v538_v59 }
  0xb7   :  { %v548_v61 = vand.u32 2139095040, %v1133_v60  ;;  %v545_v63 = vand.u32 2147483647, %v1133_v60  ;;  %vm547_vm9 = vcmp.lt.s32.totalorder %v1133_v60, 0 }
  0xb9   :  { %v549_v62 = vshrl.u32 %v548_v61, 23  ;;  %v552_v2 = vand.u32 8388607, %v545_v63  ;;  %vm546_vm10 = vcmp.le.f32.partialorder %v545_v63, 0.7853982 }
  0xbb   :  { %v814_v0 = vadd.s32 4294967169, %v549_v62  ;;  %v553_v5 = vor.u32 8388608, %v552_v2 }
  0xbd   :  { %v555_v1 = vadd.s32 1, %v814_v0  ;;  %v593_v35 = vshll.u32 %v553_v5, 8 }
  0xbf   :  { %vm556_vm2 = vcmp.gt.s32.totalorder %v555_v1, 0 }
  0xc0   :  { %v557_v3 = vsel %vm556_vm2, %v555_v1, 0  ;;  %vm637_vm2 = vweird.f32 %v1133_v60 }
  0xc1   :  { %v559_v4 = vand.u32 31, %v557_v3  ;;  %v558_v6 = vshrl.u32 %v557_v3, 5 }
  0xc3   :  { %v560_v7 = vsub.s32 32, %v559_v4  ;;  %v562_v9 = vshll.u32 %v981_v8, %v559_v4  ;;  %v565_v11 = vshll.u32 %v982_v10, %v559_v4  ;;  %v568_v13 = vshll.u32 %v983_v12, %v559_v4 }
  0xc4   :  { %v571_v15 = vshll.u32 %v984_v14, %v559_v4  ;;  %v574_v17 = vshll.u32 %v985_v16, %v559_v4  ;;  %vm577_vm3 = vcmp.lt.s32.totalorder %v558_v6, 1  ;;  %vm580_vm4 = vcmp.lt.s32.totalorder %v558_v6, 4 }
  0xc5   :  { %v561_v18 = vshrl.u32 %v981_v8, %v560_v7  ;;  %v563_v19 = vshrl.u32 %v982_v10, %v560_v7  ;;  %v566_v20 = vshrl.u32 %v983_v12, %v560_v7  ;;  %v569_v21 = vshrl.u32 %v984_v14, %v560_v7 }
  0xc6   :  { %v572_v23 = vshrl.u32 %v985_v16, %v560_v7  ;;  %v575_v32 = vshrl.u32 %v986_v29, %v560_v7  ;;  %vm578_vm5 = vcmp.lt.s32.totalorder %v558_v6, 2  ;;  %vm579_vm6 = vcmp.lt.s32.totalorder %v558_v6, 3 }
  0xc7   :  { %v564_v38 = vor.u32 %v563_v19, %v562_v9  ;;  %v567_v39 = vor.u32 %v566_v20, %v565_v11  ;;  %v570_v41 = vor.u32 %v569_v21, %v568_v13  ;;  %v160_v21 = vld [vmem:[%s1219_s4 + $0x18] sm:$0xff] }
  0xc8   :  { %v573_v42 = vor.u32 %v572_v23, %v571_v15  ;;  %v576_v43 = vor.u32 %v575_v32, %v574_v17 }
  0xc9   :  { %v581_v44 = vsel %vm577_vm3, %v561_v18, %v564_v38  ;;  %v582_v45 = vsel %vm580_vm4, %v570_v41, 2102212464  ;;  %v585_v46 = vsel %vm577_vm3, %v564_v38, %v567_v39  ;;  %v589_v47 = vsel %vm577_vm3, %v567_v39, %v570_v41 }
  0xca   :  { %v583_v48 = vsel %vm579_vm6, %v567_v39, %v582_v45  ;;  %v586_v49 = vsel %vm580_vm4, %v573_v42, 920167782  ;;  %v590_v50 = vsel %vm580_vm4, %v576_v43, 1326507024  ;;  %vm988_vm3 = vmmov 0  }
  0xcb   :  { %v587_v51 = vsel %vm579_vm6, %v570_v41, %v586_v49  ;;  %v591_v52 = vsel %vm579_vm6, %v573_v42, %v590_v50  ;;  %v584_v53 = vsel %vm578_vm5, %v581_v44, %v583_v48  ;;  %vm649_vm4 = vcmask 1043456  }
  0xcc   :  { %v588_v54 = vsel %vm578_vm5, %v585_v46, %v587_v51  ;;  %v592_v55 = vsel %vm578_vm5, %v589_v47, %v591_v52  ;;  %v600_v62 = vmul.u32 %v593_v35, %v584_v53 }
  0xcd   :  { %v1139_v57 = vmul.u32.u64.low %v593_v35, %v592_v55  ;;  %v1140_v58 = vmul.u32.u64.high %v593_v35, %v592_v55, %v1139_v57  ;;  %v1142_v59 = vmul.u32.u64.low %v593_v35, %v588_v54  ;;  %v1143_v61 = vmul.u32.u64.high %v593_v35, %v588_v54, %v1142_v59 }
  0xcf   :  { %vm602_vm7 = vc.u32 %v1140_v58, %v1142_v59  ;;  %v603_v0 = vadd.s32 1, %v1143_v61  ;;  %v601_v20 = vadd.s32 %v1142_v59, %v1140_v58 }
  0xd1   :  { %v604_v1 = vsel %vm602_vm7, %v603_v0, %v1143_v61 }
  0xd2   :  { %v605_v2 = vadd.s32 %v604_v1, %v600_v62 }
  0xd4   :  { %v606_v3 = vadd.s32 536870912, %v605_v2 }
  0xd6   :  { %v607_v4 = vshrl.u32 %v606_v3, 30 }
  0xd8   :  { %v852_v5 = vpop.f32.mrb[0].mxu0  ;;  %v608_v8 = vshll.u32 %v607_v4, 30  ;;  %v631_v46 = vsub.s32 4, %v607_v4 }
  0xd9   :  { %v144_v6 = vadd.f32 %v852_v5, %v1107_v26  ;;  %v138_v7 = vpop.f32.mrb[1].mxu0  ;;  %v801_v5 = vld [vmem:[%s1219_s4 + $0x20] sm:$0xff] }
  0xda   :  { %v139_v9 = vadd.f32 %v138_v7, %v1103_v24  ;;  %v609_v10 = vsub.s32 %v605_v2, %v608_v8  ;;  %v158_v24 = vld [vmem:[%s1219_s4 + $0x8] sm:$0xff]  ;;  %v632_v49 = vsel %vm547_vm9, %v631_v46, %v607_v4  ;;  %878 = vmatprep.mubr.msk.f32.mxu0 %vm185_vm1, %v801_v5 }
  0xdb   :  { %v634_v51 = vsel %vm546_vm10, 0, %v632_v49 }
  0xdc   :  { %v855_v11 = vpop.f32.mrb[2].mxu0  ;;  %v895_v12 = vpack.c.bf16 %v144_v6, %v139_v9  ;;  %v611_v15 = vsub.s32 0, %v609_v10  ;;  %v750_v52 = vadd.s32 3, %v634_v51  ;;  %v638_v53 = vand.u32 3, %v634_v51 }
  0xdd   :  { %v154_v13 = vadd.f32 %v855_v11, %v1109_v27  ;;  %v148_v14 = vpop.f32.mrb[3].mxu0  ;;  %v159_v27 = vld [vmem:[%s1219_s4 + $0x10] sm:$0xff] }
  0xde   :  { %v149_v16 = vadd.f32 %v148_v14, %v1105_v25  ;;  %896 = vmatprep.subr.bf16.mxu1 %v895_v12  ;;  %v815_v17 = vmin.u32 %v611_v15, %v609_v10  ;;  %v751_v54 = vand.u32 3, %v750_v52  ;;  %vm643_vm11 = vcmp.eq.s32.totalorder %v638_v53, 2 }
  0xdf   :  { %898 = vmatpush3.bf16.msra.mxu1 %v895_v12  ;;  %vm640_vm13 = vcmp.eq.s32.totalorder %v638_v53, 0  ;;  %vm639_vm15 = vcmp.lt.s32.totalorder %v638_v53, 2 }
  0xe0   :  { %v899_v18 = vpack.c.bf16 %v154_v13, %v149_v16  ;;  %v613_v19 = vclz %v815_v17  ;;  %vm756_vm12 = vcmp.eq.s32.totalorder %v751_v54, 2  ;;  %vm753_vm14 = vcmp.eq.s32.totalorder %v751_v54, 0 }
  0xe1   :  { %vm752_vm0 = vcmp.lt.s32.totalorder %v751_v54, 2 }
  0xe2   :  { %900 = vmatprep.subr.bf16.mxu1 %v899_v18  ;;  %v816_v26 = vadd.s32 4294967294, %v613_v19  ;;  %v989_v19 = vmov 0.0  }
  0xe3   :  { %902 = vmatpush3.bf16.msra.mxu1 %v899_v18 }
  0xe4   :  { %vm817_vm8 = vcmp.lt.s32.totalorder %v816_v26, 0 }
  0xe5   :  { %v616_v25 = vsel %vm817_vm8, 0, %v816_v26 }
  0xe6   :  { %865 = vmatmul.mubr.msk.f32.vlgmr.msra.gmra.mrb[0].mxu1 %vm185_vm1, %v158_v24  ;;  %v617_v23 = vsub.s32 32, %v616_v25  ;;  %v618_v29 = vshll.u32 %v609_v10, %v616_v25  ;;  %v621_v32 = vsub.s32 4294967266, %v616_v25  ;;  %v419_v24 = vld [vmem:[%s1222_s7] sm:$0xf] }
  0xe7   :  { %867 = vmatprep.mubr.msk.f32.mxu1 %vm185_vm1, %v159_v27  ;;  %422 = vperm.xlu0 %942, %v419_v24  }
  0xe8   :  { %v619_v35 = vshrl.u32 %v601_v20, %v617_v23  ;;  %v622_v38 = vadd.s32 127, %v621_v32 }
  0xea   :  { %868 = vmatmul.mubr.msk.f32.gmra.mrb[2].mxu1 %vm185_vm1, %v160_v21  ;;  %v620_v39 = vor.u32 %v619_v35, %v618_v29  ;;  %v623_v41 = vshll.u32 %v622_v38, 23 }
  0xeb   :  { %892 = vmatprep.mubr.msk.f32.mxu1 %vm988_vm3, %v989_v19  ;;  %943 = vset.pattern.permute.xlu0 %v980_v22 }
  0xec   :  { %v624_v42 = vor.u32 4788187, %v623_v41  ;;  %v627_v43 = vcvt.s32.f32 %v620_v39 }
  0xee   :  { %v625_v44 = vand.u32 2147483647, %v624_v42 }
  0xf0   :  { %v628_v45 = vmul.f32 %v627_v43, %v625_v44 }
  0xf2   :  { %v629_v47 = vxor.u32 2147483648, %v628_v45 }
  0xf4   :  { %v630_v48 = vsel %vm547_vm9, %v629_v47, %v628_v45 }
  0xf5   :  { %v633_v50 = vsel %vm546_vm10, %v1133_v60, %v630_v48 }
  0xf6   :  { %946 = vcosq.f32 %v633_v50 }
  0xf7   :  { %948 = vsinq.f32 %v633_v50 }
 0x100   :  { %v947_v55 = vpop.eup %946 }
 0x101   :  { %v949_v57 = vpop.eup %948  ;;  %v644_v58 = vxor.u32 2147483648, %v947_v55 }
 0x102   :  { %v641_v59 = vxor.u32 2147483648, %v949_v57 }
 0x103   :  { %v645_v61 = vsel %vm643_vm11, %v644_v58, %v949_v57  ;;  %v758_v63 = vsel %vm756_vm12, %v644_v58, %v949_v57 }
 0x104   :  { %v642_v62 = vsel %vm640_vm13, %v947_v55, %v641_v59  ;;  %v755_v0 = vsel %vm753_vm14, %v947_v55, %v641_v59 }
 0x105   :  { %v646_v1 = vsel %vm639_vm15, %v642_v62, %v645_v61  ;;  %v759_v2 = vsel %vm752_vm0, %v755_v0, %v758_v63 }
 0x106   :  { %v647_v3 = vsel %vm637_vm2, nan, %v646_v1  ;;  %v760_v4 = vsel %vm637_vm2, nan, %v759_v2 }
 0x1b9   :  { %v866_v6 = vpop.f32.mrb[0].mxu1 }
 0x1ba   :  { %v270_v7 = vadd.f32 %v866_v6, %v1113_v30  ;;  %v264_v8 = vpop.f32.mrb[1].mxu1  ;;  %v803_v30 = vld [vmem:[%s1219_s4 + $0x30] sm:$0xff] }
 0x1bb   :  { %v265_v9 = vadd.f32 %v264_v8, %v1111_v28  ;;  %v802_v28 = vld [vmem:[%s1219_s4 + $0x28] sm:$0xff] }
 0x1bc   :  { %v284_v10 = vmax.f32 %v270_v7, 0.0 }
 0x1bd   :  { %v283_v11 = vmax.f32 %v265_v9, 0.0  ;;  %v869_v12 = vpop.f32.mrb[2].mxu1 }
 0x1be   :  { %v280_v60 = vadd.f32 %v869_v12, %v1117_v33  ;;  %v274_v13 = vpop.f32.mrb[3].mxu1  ;;  %v987_v33 = vmov 0.0|0.0  }
 0x1bf   :  { %v903_v14 = vpack.c.bf16 %v284_v10, %v283_v11  ;;  %v275_v15 = vadd.f32 %v274_v13, %v1115_v31  ;;  %v804_v31 = vld [vmem:[%s1219_s4 + $0x38] sm:$0xff]  ;;  %911 = vmatprep.subr.bf16.mxu1 %v987_v33 }
 0x1c0   :  { %v286_v16 = vmax.f32 %v280_v60, 0.0 }
 0x1c1   :  { %v285_v17 = vmax.f32 %v275_v15, 0.0  ;;  %904 = vmatprep.subr.bf16.mxu0 %v903_v14 }
 0x1c2   :  { %906 = vmatpush3.bf16.msra.mxu0 %v903_v14 }
 0x1c3   :  { %v907_v18 = vpack.c.bf16 %v286_v16, %v285_v17 }
 0x1c5   :  { %908 = vmatprep.subr.bf16.mxu0 %v907_v18 }
 0x1c6   :  { %910 = vmatpush3.bf16.msra.mxu0 %v907_v18 }
 0x1c9   :  { %879 = vmatmul.mubr.msk.f32.vlgmr.msra.gmra.mrb[4].mxu0 %vm185_vm1, %v802_v28 }
 0x1ca   :  { %881 = vmatprep.mubr.msk.f32.mxu0 %vm185_vm1, %v803_v30 }
 0x1cd   :  { %882 = vmatmul.mubr.msk.f32.gmra.mrb[6].mxu0 %vm185_vm1, %v804_v31 }
 0x29c   :  { %v880_v26 = vpop.f32.mrb[4].mxu0 }
 0x29d   :  { %v401_v27 = vadd.f32 %v880_v26, %v1121_v36  ;;  %v395_v20 = vpop.f32.mrb[5].mxu0  ;;  %v418_v36 = vld [vmem:[%s1221_s6] sm:$0xf]  ;;  %s990_s6 = smov [#allocation2]  }
 0x29e   :  { %v396_v25 = vadd.f32 %v395_v20, %v1119_v34  ;;  %v423_v34 = vpop.permute.xlu0 %422  ;;  %s785_s29 = sshll.u32 %s990_s6, 4  ;;  %s786_s29 = int_to_ptr.vmem [resolvable:$true] %s785_s29 }
 0x29f   :  { %v415_v21 = vmax.f32 %v401_v27, 0.0  ;;  %s952_s30 = scalar_lea.vmem %s786_s29, 16  ;;  %s956_s9 = scalar_lea.vmem %s786_s29, 32 }
 0x2a0   :  { %v414_v23 = vmax.f32 %v396_v25, 0.0  ;;  %v883_v29 = vpop.f32.mrb[6].mxu0  ;;  %p953_p0 = scmp.ne.s32.totalorder %s786_s29, %s952_s30  ;;  %p957_p1 = scmp.lt.s32.totalorder %s786_s29, %s786_s29 }
 0x2a1   :  { %v411_v32 = vadd.f32 %v883_v29, %v1126_v40  ;;  %v405_v35 = vpop.f32.mrb[7].mxu0  ;;  %p958_p2 = scmp.lt.s32.totalorder %s956_s9, %s952_s30 }
 0x2a2   :  { %v912_v38 = vpack.c.bf16 %v415_v21, %v414_v23  ;;  %v406_v39 = vadd.f32 %v405_v35, %v1123_v37 }
 0x2a3   :  { %v417_v41 = vmax.f32 %v411_v32, 0.0  ;;  %p959_p3 = por %p958_p2, %p957_p1 }
 0x2a4   :  { %v416_v42 = vmax.f32 %v406_v39, 0.0  ;;  %913 = vmatpush3.bf16.msra.mxu1 %v912_v38 }
 0x2a5   :  { %914 = vmatprep.subr.bf16.mxu1 %v987_v33  ;;  %p960_p4 = pnand %p959_p3, %p953_p0 }
 0x2a6   :  { %v915_v22 = vpack.c.bf16 %v417_v41, %v416_v42 }
 0x2a8   :  { %916 = vmatpush3.bf16.msra.mxu1 %v915_v22 }
 0x2ab   :  { %893 = vmatmul.mubr.msk.f32.vlgmr.msra.gmra.mrb[4].mxu1 %vm185_vm1, %v418_v36 }
 0x37e   :  { %v494_v43 = vpop.f32.mrb[4].mxu1 }
 0x37f   :  { %v495_v44 = vadd.f32 %v494_v43, %v423_v34  ;;  %v894_v40 = vpop.f32.mrb[5].mxu1 }
 0x381   :  { %v544_v45 = vmul.f32 %v1130_v56, %v495_v44 }
 0x383   :  { %v648_v37 = vmul.f32 %v647_v3, %v544_v45  ;;  %v761_v46 = vmul.f32 %v760_v4, %v544_v45 }
 0x385   :  { %v650_v47 = vsel %vm649_vm4, %v648_v37, 0.0  ;;  %v762_v48 = vsel %vm649_vm4, %v761_v46, 0.0 }
 0x386   :  { %v651_v49 = vrot.slane %v650_v47, 4  ;;  %v763_v50 = vrot.slane %v762_v48, 4 }
 0x388   :  { %v652_v51 = vadd.f32 %v651_v49, %v650_v47  ;;  %v764_v52 = vadd.f32 %v763_v50, %v762_v48 }
 0x38a   :  { %v653_v53 = vrot.slane %v652_v51, 2  ;;  %v765_v54 = vrot.slane %v764_v52, 2 }
 0x38c   :  { %v654_v55 = vadd.f32 %v653_v53, %v652_v51  ;;  %v766_v57 = vadd.f32 %v765_v54, %v764_v52 }
 0x38e   :  { %v655_v58 = vrot.slane %v654_v55, 1  ;;  %v767_v59 = vrot.slane %v766_v57, 1 }
 0x390   :  { %v656_v61 = vadd.f32 %v655_v58, %v654_v55  ;;  %v768_v63 = vadd.f32 %v767_v59, %v766_v57 }
 0x392   :  { %v769_v62 = vmul.f32 %v656_v61, %v656_v61  ;;  %v770_v0 = vmul.f32 %v768_v63, %v768_v63 }
 0x394   :  { %v771_v56 = vadd.f32 %v770_v0, %v769_v62 }
 0x396   :  { %v772_v1 = vmax.f32 %v771_v56, 1e-30 }
 0x398   :  { %950 = vlog2.f32 %v772_v1 }
 0x3a2   :  { %v951_v2 = vpop.eup %950 }
 0x3a3   :  { %v774_v3 = vmul.f32 0.6931472, %v951_v2 }
 0x3a5   :  { %v775_v4 = vmul.f32 4.3429446, %v774_v3 }
 0x3a7   :  { %v776_v5 = vadd.f32 93.9794, %v775_v4 }
 0x3a9   :  { %v777_v6 = vmul.f32 0.008333334, %v776_v5 }
 0x3ab   :  { %778 = vst [vmem:[#allocation2] sm:$0x1] %v777_v6 }
 0x3ac   :  { %963 = shalt.err (!%p960_p4)
}
 0x3ad   :  { %s964_s12 = scalar_lea.hbm %s1223_s8, 16 }
 0x3ae   :  { %p965_p5 = scmp.ne.s32.totalorder %s1223_s8, %s964_s12  ;;  %p968_p6 = scmp.lt.u32.totalorder %s964_s12, %s1223_s8 }
 0x3b0   :  { %p970_p7 = pnand %p968_p6, %p965_p5 }
 0x3b2   :  { %973 = shalt.err (!%p970_p7)
}
 0x3b3   :  { %788 = dma.vmem_to_hbm [thread:$0]  %s786_s29, 16, %s1223_s8, [#allocation3]  }
 0x3b4   :  { %974 = dma.done.wait [#allocation3], 16  }
 0x3b5   :  { %975 = vsyncadd [#allocation3], 4294967280 }
 0x3b6   :  { %792 = vsyncpa [#allocation3], 1 }

</bundles_post_ra>
